<compile_context>
chip_gen: v6e
topology: v6e:2x2x1
jax: 0.10.0
libtpu: 0.0.40
codegen_flags: <defaults>
</compile_context>

<pallas_src>
import jax
import jax.numpy as jnp
from jax.experimental import pallas as pl
from jax.experimental.pallas import tpu as pltpu

B, C_IN, H, W = 2, 4, 16, 16
FEAT = 64                      # in_features of the (synthetic, frozen) backbone
FC_DIM = 512                   # fc_dim default of JointDenseNet
N_CATE, N_ATTR = 10, 15
N_OUT = N_CATE + N_ATTR        # concatenated head outputs (cate | attr)
KH = KW = 3
EPS = 1e-5                     # BatchNorm1d default eps


# ----------------------------- glue (plain JAX) -----------------------------

def _im2col_nhwc(x):
    """(B, H, W, C) -> (B, H*W, KH*KW*C) patches for a 3x3, stride 1, pad 1 conv."""
    b, h, w, c = x.shape
    xp = jnp.pad(x, ((0, 0), (1, 1), (1, 1), (0, 0)))
    cols = []
    for di in range(KH):
        for dj in range(KW):
            cols.append(xp[:, di:di + h, dj:dj + w, :])
    return jnp.concatenate(cols, axis=-1).reshape(b, h * w, KH * KW * c)


# ------------------------------ Pallas kernel -------------------------------

def fused_kernel(p_ref, cw_ref, cb_ref, avg_ref, hw_ref, hb_ref, out_ref):
    # Frozen backbone: 3x3 conv (im2col matmul, bf16 operands, f32 acc) -> ReLU.
    act = jnp.maximum(
        jnp.dot(p_ref[...], cw_ref[...], preferred_element_type=jnp.float32)
        + cb_ref[...], 0.0)                                        # (B*HW, FEAT) f32
    # Per-batch global average pool on the MXU: avg is (B, B*HW).
    feat = jnp.dot(avg_ref[...], act,
                   preferred_element_type=jnp.float32)             # (B, FEAT) f32
    # Both heads, fully folded offline (Linear1 + eval-BN + Linear2 -> affine).
    # TODO(synk): nn.Dropout treated as identity (eval-mode semantics).
    out_ref[...] = (jnp.dot(feat.astype(hw_ref.dtype), hw_ref[...],
                            preferred_element_type=jnp.float32)
                    + hb_ref[...])                                 # (B, N_OUT)


# -------------------------------- wrapper -----------------------------------

def prepare_kernel_params(p):
    """One-time precompute: fold eval-mode BN + both Linears of each head into a
    single (FEAT, n_out) affine map, concat the heads, cast weights to bf16,
    and build the MXU per-batch averaging matrix."""
    def fold_head(pfx):
        s = p[f"bn_g_{pfx}"] * jax.lax.rsqrt(p[f"bn_v_{pfx}"] + EPS)   # (1, FC_DIM)
        w1s = p[f"w1_{pfx}"] * s                                       # (FEAT, FC_DIM)
        b1s = p[f"b1_{pfx}"] * s + (p[f"bn_b_{pfx}"] - p[f"bn_m_{pfx}"] * s)
        w = jnp.dot(w1s, p[f"w2_{pfx}"], precision=jax.lax.Precision.HIGHEST)
        b = (jnp.dot(b1s, p[f"w2_{pfx}"], precision=jax.lax.Precision.HIGHEST)
             + p[f"b2_{pfx}"])
        return w, b                                                    # (FEAT,n), (1,n)

    wc, bc = fold_head("cate")
    wa, ba = fold_head("attr")
    head_w = jnp.concatenate([wc, wa], axis=1)                         # (FEAT, N_OUT)
    head_b = jnp.concatenate([bc, ba], axis=1)                         # (1, N_OUT)

    hw = H * W
    avg = jnp.kron(jnp.eye(B, dtype=jnp.float32),
                   jnp.full((1, hw), 1.0 / hw, jnp.float32))           # (B, B*HW)

    return {"conv_w": p["conv_w"].astype(jnp.bfloat16),
            "conv_b": p["conv_b"],
            "avg": avg,
            "head_w": head_w.astype(jnp.bfloat16),
            "head_b": head_b}


@jax.jit
def joint_densenet_forward(x_nchw, kp):
    x = jnp.transpose(x_nchw, (0, 2, 3, 1))                            # NCHW -> NHWC
    patches = _im2col_nhwc(x).reshape(B * H * W, KH * KW * C_IN)
    patches = patches.astype(jnp.bfloat16)                             # (B*HW, 9*C)

    args = (patches, kp["conv_w"], kp["conv_b"], kp["avg"],
            kp["head_w"], kp["head_b"])

    vmem = pl.BlockSpec(memory_space=pltpu.MemorySpace.VMEM)
    out = pl.pallas_call(
        fused_kernel,
        out_shape=jax.ShapeDtypeStruct((B, N_OUT), jnp.float32),
        in_specs=[vmem] * len(args),       # whole-array VMEM, no grid/pipelining
        out_specs=vmem,
    )(*args)

    return out[:, :N_CATE], out[:, N_CATE:N_CATE + N_ATTR]


# --------------------------- params & reference ------------------------------

def make_params(key):
    ks = jax.random.split(key, 18)

    def rnd(k, shape, scale=0.05):
        return jax.random.normal(k, shape, jnp.float32) * scale

    def head_params(kk, pfx):
        n_out = N_CATE if pfx == "cate" else N_ATTR
        return {
            f"w1_{pfx}": rnd(kk[0], (FEAT, FC_DIM)),
            f"b1_{pfx}": rnd(kk[1], (1, FC_DIM)),
            f"bn_g_{pfx}": 1.0 + rnd(kk[2], (1, FC_DIM)),
            f"bn_b_{pfx}": rnd(kk[3], (1, FC_DIM)),
            f"bn_m_{pfx}": rnd(kk[4], (1, FC_DIM)),
            f"bn_v_{pfx}": 1.0 + jnp.abs(rnd(kk[5], (1, FC_DIM))),
            f"w2_{pfx}": rnd(kk[6], (FC_DIM, n_out)),
            f"b2_{pfx}": rnd(kk[7], (1, n_out)),
        }

    p = {
        "conv_w": rnd(ks[0], (KH * KW * C_IN, FEAT), 0.1),
        "conv_b": rnd(ks[1], (1, FEAT), 0.1),
    }
    p.update(head_params(ks[2:10], "cate"))
    p.update(head_params(ks[10:18], "attr"))
    return p


def reference(x_nchw, p):
    x = jnp.transpose(x_nchw, (0, 2, 3, 1))
    patches = _im2col_nhwc(x)
    act = jnp.maximum(patches @ p["conv_w"] + p["conv_b"], 0.0)
    feat = act.mean(axis=1)

    def head(pfx):
        h = feat @ p[f"w1_{pfx}"] + p[f"b1_{pfx}"]
        h = ((h - p[f"bn_m_{pfx}"]) / jnp.sqrt(p[f"bn_v_{pfx}"] + EPS)
             * p[f"bn_g_{pfx}"] + p[f"bn_b_{pfx}"])
        return h @ p[f"w2_{pfx}"] + p[f"b2_{pfx}"]

    return head("cate"), head("attr")


if __name__ == "__main__":
    key = jax.random.PRNGKey(0)
    kx, kp = jax.random.split(key)
    x = jax.random.normal(kx, (B, C_IN, H, W), jnp.float32)   # NCHW, like PyTorch
    params = make_params(kp)
    kernel_params = prepare_kernel_params(params)             # one-time fold/cast

    out_cate, out_attr = jax.block_until_ready(
        joint_densenet_forward(x, kernel_params))
    ref_cate, ref_attr = reference(x, params)

    assert out_cate.shape == (B, N_CATE) and out_attr.shape == (B, N_ATTR)
    # Tolerance accommodates bf16 MXU operand rounding (both paths use the MXU;
    # the kernel additionally stores weights/patches as bf16).
    assert jnp.allclose(out_cate, ref_cate, atol=2e-3, rtol=2e-3)
    assert jnp.allclose(out_attr, ref_attr, atol=2e-3, rtol=2e-3)
    print("KERNEL_OK")
</pallas_src>

<mosaic_0001>
module attributes {stable_mosaic.version = 11 : i64} {
  func.func @fused_kernel(%arg0: memref<512x36xbf16, #tpu.memory_space<vmem>>, %arg1: memref<36x64xbf16, #tpu.memory_space<vmem>>, %arg2: memref<1x64xf32, #tpu.memory_space<vmem>>, %arg3: memref<2x512xf32, #tpu.memory_space<vmem>>, %arg4: memref<64x25xbf16, #tpu.memory_space<vmem>>, %arg5: memref<1x25xf32, #tpu.memory_space<vmem>>, %arg6: memref<2x25xf32, #tpu.memory_space<vmem>>) attributes {dimension_semantics = [], scalar_prefetch = 0 : i64, scratch_operands = 0 : i64, tpu.core_type = #tpu.core_type<tc>} {
    %c0 = arith.constant 0 : index
    %c0_0 = arith.constant 0 : index
    %0 = vector.load %arg0[%c0, %c0_0] : memref<512x36xbf16, #tpu.memory_space<vmem>>, vector<512x36xbf16>
    %c0_1 = arith.constant 0 : index
    %c0_2 = arith.constant 0 : index
    %1 = vector.load %arg1[%c0_1, %c0_2] : memref<36x64xbf16, #tpu.memory_space<vmem>>, vector<36x64xbf16>
    %cst = arith.constant dense<0.000000e+00> : vector<512x64xf32>
    %2 = tpu.matmul %0, %1, %cst {dimension_numbers = #tpu.dot_dimension_numbers<[1], [0], [0], [1], [0, 0, 1, 1], [], []>} : vector<512x36xbf16>, vector<36x64xbf16>, vector<512x64xf32> -> vector<512x64xf32>
    %c0_3 = arith.constant 0 : index
    %c0_4 = arith.constant 0 : index
    %3 = vector.load %arg2[%c0_3, %c0_4] : memref<1x64xf32, #tpu.memory_space<vmem>>, vector<1x64xf32>
    %4 = vector.broadcast %3 : vector<1x64xf32> to vector<512x64xf32>
    %5 = arith.addf %2, %4 : vector<512x64xf32>
    %cst_5 = arith.constant 0.000000e+00 : f32
    %6 = vector.broadcast %cst_5 : f32 to vector<512x64xf32>
    %7 = arith.maximumf %5, %6 : vector<512x64xf32>
    %c0_6 = arith.constant 0 : index
    %c0_7 = arith.constant 0 : index
    %8 = vector.load %arg3[%c0_6, %c0_7] : memref<2x512xf32, #tpu.memory_space<vmem>>, vector<2x512xf32>
    %cst_8 = arith.constant dense<0.000000e+00> : vector<2x64xf32>
    %9 = tpu.matmul %8, %7, %cst_8 {dimension_numbers = #tpu.dot_dimension_numbers<[1], [0], [0], [1], [0, 0, 1, 1], [], []>} : vector<2x512xf32>, vector<512x64xf32>, vector<2x64xf32> -> vector<2x64xf32>
    %10 = arith.truncf %9 : vector<2x64xf32> to vector<2x64xbf16>
    %c0_9 = arith.constant 0 : index
    %c0_10 = arith.constant 0 : index
    %11 = vector.load %arg4[%c0_9, %c0_10] : memref<64x25xbf16, #tpu.memory_space<vmem>>, vector<64x25xbf16>
    %cst_11 = arith.constant dense<0.000000e+00> : vector<2x25xf32>
    %12 = tpu.matmul %10, %11, %cst_11 {dimension_numbers = #tpu.dot_dimension_numbers<[1], [0], [0], [1], [0, 0, 1, 1], [], []>} : vector<2x64xbf16>, vector<64x25xbf16>, vector<2x25xf32> -> vector<2x25xf32>
    %c0_12 = arith.constant 0 : index
    %c0_13 = arith.constant 0 : index
    %13 = vector.load %arg5[%c0_12, %c0_13] : memref<1x25xf32, #tpu.memory_space<vmem>>, vector<1x25xf32>
    %14 = vector.broadcast %13 : vector<1x25xf32> to vector<2x25xf32>
    %15 = arith.addf %12, %14 : vector<2x25xf32>
    %c0_14 = arith.constant 0 : index
    %c0_15 = arith.constant 0 : index
    %16 = vector.load %arg6[%c0_14, %c0_15] : memref<2x25xf32, #tpu.memory_space<vmem>>, vector<2x25xf32>
    tpu.vector_store %arg6[%c0_14, %c0_15], %15 {strides = array<i32>} : memref<2x25xf32, #tpu.memory_space<vmem>>, vector<2x25xf32>,
    return
  }
}

</mosaic_0001>

<bundles_post_ra>
// kernel: joint_densenet_forward.1
= control target key start
LH: loop header
LB: loop body
LE: loop exit
PB: predicated region body
PF: predicated region fallthrough
CT: control target
= control target key end

     0   :  { %vm372_vm0 = vcmask 1041408   ;;  %vm275_vm1 = vcmask 293888   ;;  %v1299_v36 = vmov 1983009808   ;;  %v735_v38 = vlaneseq  ;;  %s1697_s1 = inlined_call_operand.vmem [shape: bf16[36,64], index: 1, kind: input, shape index: {}]   ;;  %s1698_s0 = inlined_call_operand.vmem [shape: bf16[512,36], index: 0, kind: input, shape index: {}]   ;;  %s1699_s3 = inlined_call_operand.vmem [shape: f32[2,512], index: 3, kind: input, shape index: {}]   ;;  %s1700_s2 = inlined_call_operand.vmem [shape: f32[1,64], index: 2, kind: input, shape index: {}]   ;;  %s1701_s4 = inlined_call_operand.vmem [shape: bf16[64,25], index: 4, kind: input, shape index: {}]   ;;  %s1702_s5 = inlined_call_operand.vmem [shape: f32[1,25], index: 5, kind: input, shape index: {}]   ;;  %s1703_s6 = inlined_call_operand.vmem [shape: f32[2,25], index: 6, kind: output, shape index: {}]  }
   0x1   :  { %v1259_v0 = vld [vmem:[%s1697_s1 + $0x10] ss:$0 sps:$4 sm:$0x33]   ;;  %v1260_v1 = vld [vmem:[%s1697_s1 + $0x8] sm:$0xff]   ;;  %v1262_v3 = vld [vmem:[%s1698_s0] sm:$0xff]   ;;  %v733_v37 = vunpack.c.l.s4 %v1299_v36  ;;  %vm1301_vm2 = vmmov 0  }
   0x2   :  { %1254 = vmatprep.subr.msk.bf16.mxu0 %vm372_vm0, %v1259_v0  ;;  %v374_v2 = vsel %vm372_vm0, %v1259_v0, 0  ;;  %1255 = vmatprep.subr.msk.bf16.mxu1 %vm372_vm0, %v1259_v0  ;;  %v1261_v4 = vld [vmem:[%s1697_s1] sm:$0xff]   ;;  %v1263_v5 = vld [vmem:[%s1698_s0 + $0x8] sm:$0xff]   ;;  %v1264_v6 = vld [vmem:[%s1698_s0 + $0x10] sm:$0xff]   ;;  %v736_v40 = vshrl.u32 %v735_v38, 7  ;;  %vm932_vm3 = vcmask 523264  }
   0x3   :  { %1167 = vmatpush3.bf16.msra.mxu0 %v374_v2  ;;  %1251 = vmatpush3.bf16.msra.mxu1 %v374_v2  ;;  %v1265_v7 = vld [vmem:[%s1698_s0 + $0x18] sm:$0xff]   ;;  %v1266_v8 = vld [vmem:[%s1698_s0 + $0x20] sm:$0xff]   ;;  %v1279_v10 = vld [vmem:[%s1698_s0 + $0xc8] sm:$0xff]   ;;  %v734_v39 = vunpack.c.0.s8 %v733_v37  ;;  %vm976_vm4 = vcmask 197632  }
   0x4   :  { %1168 = vmatprep.subr.bf16.mxu0 %v1260_v1  ;;  %1249 = vmatprep.subr.bf16.mxu1 %v1260_v1  ;;  %v1278_v9 = vld [vmem:[%s1698_s0 + $0xc0] sm:$0xff]   ;;  %v1282_v11 = vld [vmem:[%s1698_s0 + $0xd0] sm:$0xff]   ;;  %v1267_v12 = vld [vmem:[%s1698_s0 + $0x28] sm:$0xff]  }
   0x5   :  { %1172 = vmatprep.mubr.msk.bf16.mxu0 %vm275_vm1, %v1262_v3  ;;  %1220 = vmatprep.mubr.msk.bf16.mxu1 %vm275_vm1, %v1278_v9  ;;  %v1268_v13 = vld [vmem:[%s1698_s0 + $0x30] sm:$0xff]   ;;  %v1283_v14 = vld [vmem:[%s1698_s0 + $0xd8] sm:$0xff]   ;;  %v1286_v15 = vld [vmem:[%s1698_s0 + $0xe0] sm:$0xff]   ;;  %v737_v41 = vsub.s32 %v734_v39, %v736_v40 }
   0x6   :  { %v1269_v16 = vld [vmem:[%s1698_s0 + $0x38] sm:$0xff]   ;;  %v1287_v17 = vld [vmem:[%s1698_s0 + $0xe8] sm:$0xff]   ;;  %v1270_v18 = vld [vmem:[%s1698_s0 + $0x40] sm:$0xff]  }
   0x7   :  { %1169 = vmatpush3.bf16.msra.mxu0 %v1260_v1  ;;  %1252 = vmatpush3.bf16.msra.mxu1 %v1260_v1  ;;  %v1290_v19 = vld [vmem:[%s1698_s0 + $0xf0] sm:$0xff]   ;;  %v1271_v20 = vld [vmem:[%s1698_s0 + $0x48] sm:$0xff]   ;;  %v1291_v21 = vld [vmem:[%s1698_s0 + $0xf8] sm:$0xff]  }
   0x8   :  { %1170 = vmatprep.subr.bf16.mxu0 %v1261_v4  ;;  %1250 = vmatprep.subr.bf16.mxu1 %v1261_v4  ;;  %v1272_v22 = vld [vmem:[%s1698_s0 + $0x50] sm:$0xff]   ;;  %v1273_v23 = vld [vmem:[%s1698_s0 + $0x58] sm:$0xff]   ;;  %v1274_v24 = vld [vmem:[%s1698_s0 + $0x60] sm:$0xff]  }
   0x9   :  { %v1275_v25 = vld [vmem:[%s1698_s0 + $0x68] sm:$0xff]   ;;  %v1276_v26 = vld [vmem:[%s1698_s0 + $0x70] sm:$0xff]   ;;  %v1277_v27 = vld [vmem:[%s1698_s0 + $0x78] sm:$0xff]  }
   0xa   :  { %v1280_v28 = vld [vmem:[%s1698_s0 + $0x80] sm:$0xff]   ;;  %v1281_v29 = vld [vmem:[%s1698_s0 + $0x88] sm:$0xff]   ;;  %v1284_v30 = vld [vmem:[%s1698_s0 + $0x90] sm:$0xff]  }
   0xb   :  { %1171 = vmatpush3.bf16.msra.mxu0 %v1261_v4  ;;  %1253 = vmatpush3.bf16.msra.mxu1 %v1261_v4  ;;  %v1285_v31 = vld [vmem:[%s1698_s0 + $0x98] sm:$0xff]   ;;  %v1288_v32 = vld [vmem:[%s1698_s0 + $0xa0] sm:$0xff]   ;;  %v1289_v33 = vld [vmem:[%s1698_s0 + $0xa8] sm:$0xff]  }
   0xc   :  { %v1292_v34 = vld [vmem:[%s1698_s0 + $0xb0] sm:$0xff]   ;;  %v1293_v35 = vld [vmem:[%s1698_s0 + $0xb8] sm:$0xff]   ;;  %v729_v42 = vld [vmem:[%s1699_s3] sm:$0xff] }
   0xd   :  { %v1477_v43 = vrot.slane %v729_v42, %v737_v41  ;;  %v731_v45 = vcombine.high %v729_v42, %v729_v42 }
   0xe   :  { %1173 = vmatmul.mubr.msk.bf16.vlgmr.msra.gmra.mxu0 %vm275_vm1, %v1263_v5  ;;  %1221 = vmatmul.mubr.msk.bf16.vlgmr.msra.gmra.mxu1 %vm275_vm1, %v1279_v10 }
   0xf   :  { %1176 = vmatprep.mubr.msk.bf16.mxu0 %vm275_vm1, %v1264_v6  ;;  %1224 = vmatprep.mubr.msk.bf16.mxu1 %vm275_vm1, %v1282_v11  ;;  %v746_v44 = vcombine.high %v1477_v43, %v1477_v43  ;;  %v1481_v46 = vrot.slane %v731_v45, %v737_v41 }
  0x16   :  { %1177 = vmatmul.mubr.msk.bf16.gmra.mxu0 %vm275_vm1, %v1265_v7  ;;  %1225 = vmatmul.mubr.msk.bf16.gmra.mxu1 %vm275_vm1, %v1283_v14 }
  0x17   :  { %1180 = vmatprep.mubr.msk.bf16.mxu0 %vm275_vm1, %v1266_v8  ;;  %1228 = vmatprep.mubr.msk.bf16.mxu1 %vm275_vm1, %v1286_v15 }
  0x1e   :  { %1181 = vmatmul.mubr.msk.bf16.gmra.mxu0 %vm275_vm1, %v1267_v12  ;;  %1229 = vmatmul.mubr.msk.bf16.gmra.mxu1 %vm275_vm1, %v1287_v17 }
  0x1f   :  { %1184 = vmatprep.mubr.msk.bf16.mxu0 %vm275_vm1, %v1268_v13  ;;  %1232 = vmatprep.mubr.msk.bf16.mxu1 %vm275_vm1, %v1290_v19 }
  0x26   :  { %1185 = vmatmul.mubr.msk.bf16.gmra.mxu0 %vm275_vm1, %v1269_v16  ;;  %1233 = vmatmul.mubr.msk.bf16.gmra.mxu1 %vm275_vm1, %v1291_v21 }
  0x27   :  { %1188 = vmatprep.mubr.msk.bf16.mxu0 %vm275_vm1, %v1270_v18  ;;  %816 = vmatprep.mubr.f32.mxu1 %v746_v44 }
  0x2e   :  { %1189 = vmatmul.mubr.msk.bf16.gmra.mxu0 %vm275_vm1, %v1271_v20  ;;  %v1536_v20 = vld [vmem:[%s1700_s2] ss:$0 sm:$0xff] }
  0x2f   :  { %1192 = vmatprep.mubr.msk.bf16.mxu0 %vm275_vm1, %v1272_v22 }
  0x36   :  { %1193 = vmatmul.mubr.msk.bf16.gmra.mxu0 %vm275_vm1, %v1273_v23 }
  0x37   :  { %1196 = vmatprep.mubr.msk.bf16.mxu0 %vm275_vm1, %v1274_v24 }
  0x3e   :  { %1197 = vmatmul.mubr.msk.bf16.gmra.mxu0 %vm275_vm1, %v1275_v25 }
  0x3f   :  { %1200 = vmatprep.mubr.msk.bf16.mxu0 %vm275_vm1, %v1276_v26 }
  0x46   :  { %1201 = vmatmul.mubr.msk.bf16.gmra.mxu0 %vm275_vm1, %v1277_v27 }
  0x47   :  { %1204 = vmatprep.mubr.msk.bf16.mxu0 %vm275_vm1, %v1280_v28 }
  0x4e   :  { %1205 = vmatmul.mubr.msk.bf16.gmra.mxu0 %vm275_vm1, %v1281_v29 }
  0x4f   :  { %1208 = vmatprep.mubr.msk.bf16.mxu0 %vm275_vm1, %v1284_v30 }
  0x56   :  { %1209 = vmatmul.mubr.msk.bf16.gmra.mxu0 %vm275_vm1, %v1285_v31 }
  0x57   :  { %1212 = vmatprep.mubr.msk.bf16.mxu0 %vm275_vm1, %v1288_v32 }
  0x5e   :  { %1213 = vmatmul.mubr.msk.bf16.gmra.mxu0 %vm275_vm1, %v1289_v33 }
  0x5f   :  { %1216 = vmatprep.mubr.msk.bf16.mxu0 %vm275_vm1, %v1292_v34 }
  0x66   :  { %1217 = vmatmul.mubr.msk.bf16.gmra.mxu0 %vm275_vm1, %v1293_v35 }
  0xce   :  { %v1483_v47 = vpop.f32.mrf.mxu0  ;;  %v1505_v0 = vpop.f32.mrf.mxu1 }
  0xd0   :  { %v1485_v48 = vpop.f32.mrf.mxu0  ;;  %v1511_v3 = vpop.f32.mrf.mxu1 }
  0xd2   :  { %v1487_v49 = vpop.f32.mrf.mxu0  ;;  %v1517_v6 = vpop.f32.mrf.mxu1 }
  0xd4   :  { %v1489_v50 = vpop.f32.mrf.mxu0  ;;  %v1523_v9 = vpop.f32.mrf.mxu1 }
  0xd6   :  { %v1491_v51 = vpop.f32.mrf.mxu0  ;;  %v1527_v12 = vpop.f32.mrf.mxu1 }
  0xd8   :  { %v1493_v52 = vpop.f32.mrf.mxu0  ;;  %v1529_v15 = vpop.f32.mrf.mxu1 }
  0xda   :  { %v1495_v53 = vpop.f32.mrf.mxu0  ;;  %v1531_v18 = vpop.f32.mrf.mxu1 }
  0xdc   :  { %v1497_v54 = vpop.f32.mrf.mxu0  ;;  %v1539_v23 = vpop.f32.mrf.mxu1 }
  0xde   :  { %v1182_v55 = vpop.f32.mrf.mxu0  ;;  %v1548_v33 = vpop.f32.mrf.mxu1 }
  0xe0   :  { %v1499_v56 = vpop.f32.mrf.mxu0  ;;  %v1558_v45 = vpop.f32.mrf.mxu1 }
  0xe2   :  { %v1183_v57 = vpop.f32.mrf.mxu0 }
  0xe3   :  { %v454_v41 = vadd.f32 %v1183_v57, %v1536_v20 }
  0xe4   :  { %v1501_v58 = vpop.f32.mrf.mxu0 }
  0xe5   :  { %v676_v57 = vmax.f32 %v454_v41, 0.0 }
  0xe6   :  { %v1186_v59 = vpop.f32.mrf.mxu0 }
  0xe7   :  { %v467_v26 = vadd.f32 %v1186_v59, %v1536_v20 }
  0xe8   :  { %v458_v60 = vpop.f32.mrf.mxu0 }
  0xe9   :  { %v679_v36 = vmax.f32 %v467_v26, 0.0  ;;  %v459_v37 = vadd.f32 %v1536_v20, %v458_v60  ;;  %v451_v60 = vadd.f32 %v1182_v55, %v1536_v20  ;;  %v443_v26 = vadd.f32 %v1536_v20, %v1499_v56 }
  0xea   :  { %v1187_v61 = vpop.f32.mrf.mxu0 }
  0xeb   :  { %v470_v21 = vadd.f32 %v1187_v61, %v1536_v20 }
  0xec   :  { %v461_v62 = vpop.f32.mrf.mxu0 }
  0xed   :  { %v680_v30 = vmax.f32 %v470_v21, 0.0  ;;  %v462_v31 = vadd.f32 %v1536_v20, %v461_v62  ;;  %v677_v62 = vmax.f32 %v459_v37, 0.0  ;;  %v446_v21 = vadd.f32 %v1536_v20, %v1501_v58 }
  0xee   :  { %v1503_v63 = vpop.f32.mrf.mxu0 }
  0xef   :  { %v678_v42 = vmax.f32 %v462_v31, 0.0 }
  0xf0   :  { %v1507_v1 = vpop.f32.mrf.mxu0 }
  0xf2   :  { %v1509_v2 = vpop.f32.mrf.mxu0 }
  0xf4   :  { %v1513_v4 = vpop.f32.mrf.mxu0 }
  0xf6   :  { %v1515_v5 = vpop.f32.mrf.mxu0 }
  0xf7   :  { %v499_v56 = vadd.f32 %v1515_v5, %v1536_v20 }
  0xf8   :  { %v1519_v7 = vpop.f32.mrf.mxu0 }
  0xf9   :  { %v687_v41 = vmax.f32 %v499_v56, 0.0 }
  0xfa   :  { %v1521_v8 = vpop.f32.mrf.mxu0 }
  0xfc   :  { %v1525_v10 = vpop.f32.mrf.mxu0 }
  0xfe   :  { %v1198_v11 = vpop.f32.mrf.mxu0 }
  0xff   :  { %v515_v59 = vadd.f32 %v1198_v11, %v1536_v20  ;;  %v1569_v11 = vpop.f32.mrf.mxu1 }
 0x100   :  { %v506_v13 = vpop.f32.mrf.mxu0 }
 0x101   :  { %v507_v55 = vadd.f32 %v1536_v20, %v506_v13  ;;  %v1582_v13 = vpop.f32.mrf.mxu1 }
 0x102   :  { %v1199_v14 = vpop.f32.mrf.mxu0 }
 0x103   :  { %v518_v39 = vadd.f32 %v1199_v14, %v1536_v20  ;;  %v689_v31 = vmax.f32 %v507_v55, 0.0  ;;  %v1234_v5 = vpop.f32.mrf.mxu1 }
 0x104   :  { %v509_v16 = vpop.f32.mrf.mxu0 }
 0x105   :  { %v692_v14 = vmax.f32 %v518_v39, 0.0  ;;  %v430_v39 = vadd.f32 %v1536_v20, %v1497_v54 }
 0x106   :  { %v1202_v17 = vpop.f32.mrf.mxu0 }
 0x107   :  { %v531_v24 = vadd.f32 %v1202_v17, %v1536_v20 }
 0x108   :  { %v522_v19 = vpop.f32.mrf.mxu0 }
 0x109   :  { %v695_v34 = vmax.f32 %v531_v24, 0.0  ;;  %v523_v35 = vadd.f32 %v1536_v20, %v522_v19  ;;  %v510_v19 = vadd.f32 %v1536_v20, %v509_v16  ;;  %v691_v24 = vmax.f32 %v515_v59, 0.0 }
 0x10a   :  { %v1203_v22 = vpop.f32.mrf.mxu0  ;;  %v502_v16 = vadd.f32 %v1521_v8, %v1536_v20  ;;  %v673_v8 = vmax.f32 %v443_v26, 0.0  ;;  %v427_v59 = vadd.f32 %v1536_v20, %v1493_v52  ;;  %v419_v52 = vadd.f32 %v1483_v47, %v1536_v20 }
 0x10b   :  { %v534_v25 = vadd.f32 %v1203_v22, %v1536_v20  ;;  %v693_v61 = vmax.f32 %v523_v35, 0.0  ;;  %v690_v58 = vmax.f32 %v510_v19, 0.0  ;;  %v650_v19 = vpop.f32.mrf.mxu1  ;;  %v475_v47 = vadd.f32 %v1536_v20, %v1507_v1 }
 0x10c   :  { %v525_v27 = vpop.f32.mrf.mxu0 }
 0x10d   :  { %v696_v28 = vmax.f32 %v534_v25, 0.0  ;;  %v526_v29 = vadd.f32 %v1536_v20, %v525_v27  ;;  %v675_v25 = vmax.f32 %v451_v60, 0.0  ;;  %v422_v60 = vadd.f32 %v1487_v49, %v1536_v20  ;;  %v1235_v26 = vpop.f32.mrf.mxu1 }
 0x10e   :  { %v1546_v32 = vpop.f32.mrf.mxu0  ;;  %v478_v49 = vadd.f32 %v1536_v20, %v1513_v4  ;;  %v662_v56 = vadd.f32 %v1235_v26, %v1536_v20 }
 0x10f   :  { %1091 = vmatprep.subr.mxu1 %v696_v28  ;;  %v694_v40 = vmax.f32 %v526_v29, 0.0  ;;  %v438_v28 = vadd.f32 %v1495_v53, %v1536_v20  ;;  %v674_v29 = vmax.f32 %v446_v21, 0.0  ;;  %v494_v53 = vadd.f32 %v1536_v20, %v1525_v10 }
 0x110   :  { %v1552_v38 = vpop.f32.mrf.mxu0  ;;  %1092 = vmatpush3.msra.mxu1 %v680_v30  ;;  %v486_v10 = vadd.f32 %v1509_v2, %v1536_v20  ;;  %v669_v21 = vmax.f32 %v427_v59, 0.0  ;;  %v668_v55 = vmax.f32 %v422_v60, 0.0  ;;  %v682_v4 = vmax.f32 %v478_v49, 0.0 }
 0x111   :  { %1093 = vmatprep.subr.mxu1 %v695_v34  ;;  %v435_v34 = vadd.f32 %v1491_v51, %v1536_v20  ;;  %v672_v37 = vmax.f32 %v438_v28, 0.0  ;;  %v491_v51 = vadd.f32 %v1536_v20, %v1519_v7  ;;  %v686_v54 = vmax.f32 %v494_v53, 0.0 }
 0x112   :  { %v1556_v44 = vpop.f32.mrf.mxu0  ;;  %1094 = vmatpush3.msra.mxu1 %v679_v36  ;;  %v688_v36 = vmax.f32 %v502_v16, 0.0  ;;  %v483_v7 = vadd.f32 %v1503_v63, %v1536_v20  ;;  %v684_v2 = vmax.f32 %v486_v10, 0.0  ;;  %v411_v28 = vadd.f32 %v1536_v20, %v1485_v48 }
 0x113   :  { %1095 = vmatprep.subr.mxu1 %v694_v40  ;;  %v651_v10 = vadd.f32 %v1536_v20, %v650_v19  ;;  %v643_v19 = vadd.f32 %v1548_v33, %v1536_v20  ;;  %v635_v33 = vadd.f32 %v1536_v20, %v1558_v45 }
 0x114   :  { %v1562_v17 = vpop.f32.mrf.mxu0  ;;  %1096 = vmatpush3.msra.mxu1 %v678_v42  ;;  %v671_v42 = vmax.f32 %v435_v34, 0.0  ;;  %v683_v16 = vmax.f32 %v483_v7, 0.0  ;;  %v665_v53 = vmax.f32 %v411_v28, 0.0 }
 0x115   :  { %1097 = vmatprep.subr.mxu1 %v693_v61  ;;  %v721_v45 = vmax.f32 %v635_v33, 0.0 }
 0x116   :  { %v1567_v22 = vpop.f32.mrf.mxu0  ;;  %1098 = vmatpush3.msra.mxu1 %v677_v62  ;;  %v670_v62 = vmax.f32 %v430_v39, 0.0  ;;  %v747_v39 = vcombine.high %v1481_v46, %v1481_v46 }
 0x117   :  { %1099 = vmatprep.subr.mxu1 %v692_v14 }
 0x118   :  { %v1574_v27 = vpop.f32.mrf.mxu0  ;;  %1100 = vmatpush3.msra.mxu1 %v676_v57  ;;  %v685_v57 = vmax.f32 %v491_v51, 0.0 }
 0x119   :  { %1101 = vmatprep.subr.mxu1 %v691_v24 }
 0x11a   :  { %v1580_v30 = vpop.f32.mrf.mxu0  ;;  %1102 = vmatpush3.msra.mxu1 %v675_v25  ;;  %v414_v25 = vadd.f32 %v1536_v20, %v1489_v50  ;;  %v653_v50 = vpop.f32.mrf.mxu1 }
 0x11b   :  { %1103 = vmatprep.subr.mxu1 %v690_v58  ;;  %v667_v58 = vmax.f32 %v419_v52, 0.0  ;;  %v654_v51 = vadd.f32 %v1536_v20, %v653_v50  ;;  %v550_v50 = vadd.f32 %v1556_v44, %v1536_v20  ;;  %v542_v44 = vadd.f32 %v1536_v20, %v1562_v17 }
 0x11c   :  { %v1588_v35 = vpop.f32.mrf.mxu0  ;;  %1104 = vmatpush3.msra.mxu1 %v674_v29  ;;  %v1300_v17 = vmov 0.0  }
 0x11d   :  { %1105 = vmatprep.subr.mxu1 %v689_v31  ;;  %v666_v31 = vmax.f32 %v414_v25, 0.0  ;;  %v726_v7 = vmax.f32 %v654_v51, 0.0  ;;  %v723_v25 = vmax.f32 %v643_v19, 0.0 }
 0x11e   :  { %v1594_v40 = vpop.f32.mrf.mxu0  ;;  %1106 = vmatpush3.msra.mxu1 %v673_v8  ;;  %v681_v8 = vmax.f32 %v475_v47, 0.0  ;;  %v627_v47 = vadd.f32 %v1527_v12, %v1536_v20  ;;  %v619_v12 = vadd.f32 %v1536_v20, %v1529_v15 }
 0x11f   :  { %1107 = vmatprep.subr.mxu1 %v688_v36  ;;  %v659_v36 = vadd.f32 %v1234_v5, %v1536_v20 }
 0x120   :  { %v1600_v61 = vpop.f32.mrf.mxu0  ;;  %1108 = vmatpush3.msra.mxu1 %v672_v37  ;;  %v717_v15 = vmax.f32 %v619_v12, 0.0 }
 0x121   :  { %1109 = vmatprep.subr.mxu1 %v687_v41  ;;  %v728_v41 = vmax.f32 %v662_v56, 0.0  ;;  %v727_v5 = vmax.f32 %v659_v36, 0.0 }
 0x122   :  { %v1215_v14 = vpop.f32.mrf.mxu0  ;;  %1110 = vmatpush3.msra.mxu1 %v671_v42 }
 0x123   :  { %1111 = vmatprep.subr.mxu1 %v686_v54 }
 0x124   :  { %v1610_v24 = vpop.f32.mrf.mxu0  ;;  %1112 = vmatpush3.msra.mxu1 %v670_v62  ;;  %v646_v62 = vadd.f32 %v1569_v11, %v1536_v20  ;;  %v638_v11 = vadd.f32 %v1536_v20, %v1582_v13 }
 0x125   :  { %1113 = vmatprep.subr.mxu1 %v685_v57  ;;  %v582_v57 = vadd.f32 %v1215_v14, %v1536_v20  ;;  %v574_v14 = vadd.f32 %v1536_v20, %v1610_v24 }
 0x126   :  { %v1218_v63 = vpop.f32.mrf.mxu0  ;;  %1114 = vmatpush3.msra.mxu1 %v669_v21  ;;  %v725_v21 = vmax.f32 %v651_v10, 0.0  ;;  %v724_v49 = vmax.f32 %v646_v62, 0.0  ;;  %v722_v13 = vmax.f32 %v638_v11, 0.0 }
 0x127   :  { %1115 = vmatprep.subr.mxu1 %v684_v2  ;;  %v595_v37 = vadd.f32 %v1218_v63, %v1536_v20  ;;  %v630_v63 = vadd.f32 %v1531_v18, %v1536_v20  ;;  %v706_v24 = vmax.f32 %v574_v14, 0.0  ;;  %v622_v18 = vadd.f32 %v1536_v20, %v1539_v23 }
 0x128   :  { %v586_v29 = vpop.f32.mrf.mxu0  ;;  %1116 = vmatpush3.msra.mxu1 %v668_v55  ;;  %v708_v55 = vmax.f32 %v582_v57, 0.0 }
 0x129   :  { %1117 = vmatprep.subr.mxu1 %v683_v16  ;;  %v711_v54 = vmax.f32 %v595_v37, 0.0  ;;  %v587_v60 = vadd.f32 %v1536_v20, %v586_v29  ;;  %v566_v16 = vadd.f32 %v1580_v30, %v1536_v20  ;;  %v720_v28 = vmax.f32 %v630_v63, 0.0 }
 0x12a   :  { %v1219_v34 = vpop.f32.mrf.mxu0  ;;  %1118 = vmatpush3.msra.mxu1 %v667_v58  ;;  %v563_v58 = vadd.f32 %v1567_v22, %v1536_v20  ;;  %v558_v30 = vadd.f32 %v1536_v20, %v1588_v35  ;;  %v555_v22 = vadd.f32 %v1536_v20, %v1574_v27  ;;  %v718_v23 = vmax.f32 %v622_v18, 0.0 }
 0x12b   :  { %v598_v1 = vadd.f32 %v1219_v34, %v1536_v20  ;;  %1119 = vmatprep.subr.mxu1 %v682_v4  ;;  %v709_v2 = vmax.f32 %v587_v60, 0.0  ;;  %v704_v29 = vmax.f32 %v566_v16, 0.0  ;;  %v719_v4 = vmax.f32 %v627_v47, 0.0 }
 0x12c   :  { %v589_v48 = vpop.f32.mrf.mxu0  ;;  %1120 = vmatpush3.msra.mxu1 %v666_v31  ;;  %v703_v56 = vmax.f32 %v563_v58, 0.0  ;;  %v614_v31 = vadd.f32 %v1517_v6, %v1536_v20  ;;  %v702_v35 = vmax.f32 %v558_v30, 0.0  ;;  %v611_v34 = vadd.f32 %v1505_v0, %v1536_v20 }
 0x12d   :  { %v712_v42 = vmax.f32 %v598_v1, 0.0  ;;  %1121 = vmatprep.subr.mxu1 %v681_v8  ;;  %v590_v59 = vadd.f32 %v1536_v20, %v589_v48  ;;  %v547_v8 = vadd.f32 %v1546_v32, %v1536_v20  ;;  %v701_v27 = vmax.f32 %v555_v22, 0.0 }
 0x12e   :  { %1122 = vmatpush3.msra.mxu1 %v665_v53  ;;  %v716_v36 = vmax.f32 %v614_v31, 0.0  ;;  %v606_v6 = vadd.f32 %v1536_v20, %v1523_v9  ;;  %v700_v1 = vmax.f32 %v550_v50, 0.0  ;;  %v715_v53 = vmax.f32 %v611_v34, 0.0 }
 0x12f   :  { %817 = vmatmul.mubr.f32.vlgmr.msra.gmra.mxu1 %v1477_v43  ;;  %1126 = vmatprep.subr.mxu1 %v728_v41  ;;  %v710_v52 = vmax.f32 %v590_v59, 0.0  ;;  %v579_v43 = vadd.f32 %v1594_v40, %v1536_v20  ;;  %v571_v40 = vadd.f32 %v1536_v20, %v1600_v61  ;;  %v603_v0 = vadd.f32 %v1536_v20, %v1511_v3  ;;  %v1295_v3 = vld [vmem:[%s1701_s4 + $0x18] sm:$0xff]  }
 0x130   :  { %1127 = vmatpush3.msra.mxu1 %v712_v42  ;;  %886 = vmatprep.mubr.f32.mxu1 %v747_v39  ;;  %v699_v37 = vmax.f32 %v547_v8, 0.0  ;;  %v539_v32 = vadd.f32 %v1536_v20, %v1552_v38  ;;  %v714_v48 = vmax.f32 %v606_v6, 0.0  ;;  %v698_v39 = vmax.f32 %v542_v44, 0.0  ;;  %v1296_v20 = vld [vmem:[%s1701_s4 + $0x10] sm:$0xff]   ;;  %v1297_v38 = vld [vmem:[%s1701_s4 + $0x8] sm:$0xff]  }
 0x131   :  { %1128 = vmatprep.subr.mxu1 %v727_v5  ;;  %v707_v26 = vmax.f32 %v579_v43, 0.0  ;;  %v705_v61 = vmax.f32 %v571_v40, 0.0  ;;  %v713_v9 = vmax.f32 %v603_v0, 0.0 }
 0x132   :  { %1129 = vmatpush3.msra.mxu1 %v711_v54  ;;  %v697_v41 = vmax.f32 %v539_v32, 0.0 }
 0x133   :  { %1130 = vmatprep.subr.mxu1 %v726_v7  ;;  %v1050_v7 = vld [vmem:[%s1702_s5] ss:$0 sm:$0xff] }
 0x134   :  { %1131 = vmatpush3.msra.mxu1 %v710_v52 }
 0x135   :  { %1132 = vmatprep.subr.mxu1 %v725_v21 }
 0x136   :  { %1133 = vmatpush3.msra.mxu1 %v709_v2 }
 0x137   :  { %1134 = vmatprep.subr.mxu1 %v724_v49 }
 0x138   :  { %1135 = vmatpush3.msra.mxu1 %v708_v55 }
 0x139   :  { %1136 = vmatprep.subr.mxu1 %v723_v25 }
 0x13a   :  { %1137 = vmatpush3.msra.mxu1 %v707_v26 }
 0x13b   :  { %1138 = vmatprep.subr.mxu1 %v722_v13 }
 0x13c   :  { %1139 = vmatpush3.msra.mxu1 %v706_v24 }
 0x13d   :  { %1140 = vmatprep.subr.mxu1 %v721_v45 }
 0x13e   :  { %1141 = vmatpush3.msra.mxu1 %v705_v61 }
 0x13f   :  { %1142 = vmatprep.subr.mxu1 %v720_v28 }
 0x140   :  { %1143 = vmatpush3.msra.mxu1 %v704_v29 }
 0x141   :  { %1144 = vmatprep.subr.mxu1 %v719_v4 }
 0x142   :  { %1145 = vmatpush3.msra.mxu1 %v703_v56 }
 0x143   :  { %1146 = vmatprep.subr.mxu1 %v718_v23 }
 0x144   :  { %1147 = vmatpush3.msra.mxu1 %v702_v35 }
 0x145   :  { %1148 = vmatprep.subr.mxu1 %v717_v15 }
 0x146   :  { %1149 = vmatpush3.msra.mxu1 %v701_v27 }
 0x147   :  { %1150 = vmatprep.subr.mxu1 %v716_v36 }
 0x148   :  { %1151 = vmatpush3.msra.mxu1 %v700_v1 }
 0x149   :  { %1152 = vmatprep.subr.mxu1 %v715_v53 }
 0x14a   :  { %1153 = vmatpush3.msra.mxu1 %v699_v37 }
 0x14b   :  { %1154 = vmatprep.subr.mxu1 %v714_v48 }
 0x14c   :  { %1155 = vmatpush3.msra.mxu1 %v698_v39 }
 0x14d   :  { %1156 = vmatprep.subr.mxu1 %v713_v9 }
 0x14e   :  { %1157 = vmatpush3.msra.mxu1 %v697_v41 }
 0x14f   :  { %887 = vmatmul.mubr.f32.vlgmr.msra.gmra.mxu1 %v1481_v46  ;;  %1236 = vmatprep.subr.bf16.mxu1 %v1300_v17  ;;  %v1298_v46 = vld [vmem:[%s1701_s4] sm:$0xff]  }
 0x150   :  { %1237 = vmatpush3.bf16.msra.mxu1 %v1295_v3  ;;  %1244 = vmatprep.mubr.msk.bf16.mxu1 %vm1301_vm2, %v1300_v17 }
 0x151   :  { %1238 = vmatprep.subr.bf16.mxu1 %v1300_v17 }
 0x154   :  { %1239 = vmatpush3.bf16.msra.mxu1 %v1296_v20 }
 0x155   :  { %1240 = vmatprep.subr.bf16.mxu1 %v1300_v17 }
 0x158   :  { %1241 = vmatpush3.bf16.msra.mxu1 %v1297_v38 }
 0x159   :  { %1242 = vmatprep.subr.bf16.mxu1 %v1300_v17 }
 0x15c   :  { %1243 = vmatpush3.bf16.msra.mxu1 %v1298_v46 }
 0x1ef   :  { %v1123_v51 = vpop.f32.mrf.mxu1 }
 0x1f1   :  { %v1124_v42 = vpop.f32.mrf.mxu1 }
 0x1f2   :  { %v1125_v10 = vadd.f32 %v1124_v42, %v1123_v51 }
 0x20f   :  { %v1158_v59 = vpop.f32.mrf.mxu1 }
 0x211   :  { %v1159_v5 = vpop.f32.mrf.mxu1 }
 0x212   :  { %v1160_v54 = vadd.f32 %v1159_v5, %v1158_v59 }
 0x214   :  { %v889_v60 = vadd.f32 %v1160_v54, %v1125_v10 }
 0x216   :  { %v892_v62 = vpack.c.bf16 %v889_v60, %v889_v60 }
 0x218   :  { %1245 = vmatmul.mubr.msk.bf16.vlgmr.msra.gmra.mxu1 %vm932_vm3, %v892_v62 }
 0x2d8   :  { %v970_v57 = vpop.f32.mrf.mxu1 }
 0x2d9   :  { %v971_v52 = vadd.f32 %v1050_v7, %v970_v57 }
 0x2da   :  { %v1246_v19 = vpop.f32.mrf.mxu1 }
 0x2db   :  { %977 = vst.msk [vmem:[%s1703_s6] sm:$0x3] %vm976_vm4, %v971_v52 }
 0x2dc   :  { %v973_v21 = vpop.f32.mrf.mxu1 }
 0x2de   :  { %v1247_v43 = vpop.f32.mrf.mxu1 }

</bundles_post_ra>
